<compile_context>
chip_gen: v7x
topology: tpu7x:2x2x1
jax: 0.10.0
libtpu: 0.0.40
codegen_flags: <defaults>
</compile_context>

<pallas_src>
import functools

import jax
import jax.numpy as jnp
from jax.experimental import pallas as pl
from jax.experimental.pallas import tpu as pltpu

HIDDEN = 768
EPS = 1e-5
VMEM_LIMIT = 32 * 1024 * 1024


def _round_up(v, m):
    return ((v + m - 1) // m) * m


# ---------------------------------------------------------------------------
# Two-pass path, stage 1: full-batch BN stats -> per-feature scale/shift.
# ---------------------------------------------------------------------------
def bn_stats_kernel(gamma_ref, beta_ref, x_ref, ss_ref, acc_ref, *, batch):
    # x_ref:   (TB_STATS, H) tile of the zero-padded input
    # ss_ref:  (2, H) output: row 0 = scale = gamma*rstd, row 1 = shift = beta - mean*scale
    # acc_ref: (2, H) f32 scratch: row 0 = sum(x), row 1 = sum(x*x)
    i = pl.program_id(0)

    @pl.when(i == 0)
    def _():
        acc_ref[...] = jnp.zeros_like(acc_ref)

    x = x_ref[...].astype(jnp.float32)
    # Padded batch rows are zeros -> contribute nothing; divide by the true batch.
    acc_ref[...] += jnp.concatenate(
        [jnp.sum(x, axis=0, keepdims=True),
         jnp.sum(x * x, axis=0, keepdims=True)],
        axis=0,
    )

    @pl.when(i == pl.num_programs(0) - 1)
    def _():
        acc = acc_ref[...]
        mean = acc[0:1, :] / batch                                   # (1, H)
        var = jnp.maximum(acc[1:2, :] / batch - mean * mean, 0.0)    # biased var
        rstd = jax.lax.rsqrt(var + EPS)
        scale = gamma_ref[...] * rstd
        shift = beta_ref[...] - mean * scale
        ss_ref[...] = jnp.concatenate([scale, shift], axis=0)


# ---------------------------------------------------------------------------
# Two-pass path, stage 2: y = x*scale + shift (once per batch tile), then MXU.
# ---------------------------------------------------------------------------
def bn_linear_kernel(ss_ref, x_ref, w_ref, bias_ref, o_ref, y_bf_ref):
    # ss_ref: (2, H); x_ref: (TB, H); w_ref: (TF, H) bf16 (PyTorch Linear layout)
    # bias_ref: (1, TF); o_ref: (TB, TF); y_bf_ref: (TB, H) bf16 scratch
    @pl.when(pl.program_id(1) == 0)
    def _():
        x = x_ref[...].astype(jnp.float32)
        y_bf_ref[...] = (x * ss_ref[0:1, :] + ss_ref[1:2, :]).astype(jnp.bfloat16)

    out = jax.lax.dot_general(
        y_bf_ref[...], w_ref[...],
        dimension_numbers=(((1,), (1,)), ((), ())),     # y @ w.T on the MXU
        preferred_element_type=jnp.float32,
    )
    o_ref[...] = (out + bias_ref[...]).astype(o_ref.dtype)


# ---------------------------------------------------------------------------
# Fused single-pass path (x resident in VMEM, grid over feature tiles only).
# ---------------------------------------------------------------------------
def bn_linear_fused_kernel(gamma_ref, beta_ref, x_ref, w_ref, bias_ref, o_ref,
                           y_bf_ref, *, batch):
    @pl.when(pl.program_id(0) == 0)
    def _():
        x = x_ref[...].astype(jnp.float32)
        mean = jnp.sum(x, axis=0, keepdims=True) / batch
        var = jnp.maximum(jnp.sum(x * x, axis=0, keepdims=True) / batch - mean * mean, 0.0)
        rstd = jax.lax.rsqrt(var + EPS)
        scale = gamma_ref[...] * rstd
        shift = beta_ref[...] - mean * scale
        y_bf_ref[...] = (x * scale + shift).astype(jnp.bfloat16)

    out = jax.lax.dot_general(
        y_bf_ref[...], w_ref[...],
        dimension_numbers=(((1,), (1,)), ((), ())),
        preferred_element_type=jnp.float32,
    )
    o_ref[...] = (out + bias_ref[...]).astype(o_ref.dtype)


# ---------------------------------------------------------------------------
# Wrapper
# ---------------------------------------------------------------------------
def bertfc_forward(x, gamma, beta, w, b, *, fused=None, tb=None, tf=None):
    """x: (B, 768); w: (feature, 768) PyTorch-layout Linear weight; b: (feature,)."""
    B, H = x.shape
    assert H == HIDDEN
    F = w.shape[0]

    if tf is None:
        tf = min(512, _round_up(F, 128))
    F_pad = _round_up(F, tf)
    nf = F_pad // tf

    B8 = _round_up(B, 8)
    if fused is None:
        # Resident f32 x (double-buffered) <= 6 MiB: safe on v5e/v6e and v7x (64 MiB VMEM).
        fused = B8 <= 1024
    if fused:
        B_pad = B8
    else:
        if tb is None:
            tb = min(512, B8)
        B_pad = _round_up(B, tb)

    x_p = x if B_pad == B else jnp.pad(x, ((0, B_pad - B), (0, 0)))
    w_p = w if F_pad == F else jnp.pad(w, ((0, F_pad - F), (0, 0)))
    w_p = w_p.astype(jnp.bfloat16)          # stream weight in bf16 (half the DMA bytes)
    b_p = b if F_pad == F else jnp.pad(b, (0, F_pad - F))
    bias2 = b_p.reshape(1, F_pad).astype(jnp.float32)
    gamma2 = gamma.reshape(1, H).astype(jnp.float32)
    beta2 = beta.reshape(1, H).astype(jnp.float32)

    if fused:
        out_p = pl.pallas_call(
            functools.partial(bn_linear_fused_kernel, batch=B),
            out_shape=jax.ShapeDtypeStruct((B_pad, F_pad), x.dtype),
            grid=(nf,),
            in_specs=[
                pl.BlockSpec((1, H), lambda j: (0, 0)),         # gamma
                pl.BlockSpec((1, H), lambda j: (0, 0)),         # beta
                pl.BlockSpec((B_pad, H), lambda j: (0, 0)),     # x, resident (DMA'd once)
                pl.BlockSpec((tf, H), lambda j: (j, 0)),        # bf16 weight tile
                pl.BlockSpec((1, tf), lambda j: (0, j)),        # bias tile
            ],
            out_specs=pl.BlockSpec((B_pad, tf), lambda j: (0, j)),
            scratch_shapes=[pltpu.VMEM((B_pad, H), jnp.bfloat16)],
            compiler_params=pltpu.CompilerParams(
                dimension_semantics=("arbitrary",),
                vmem_limit_bytes=VMEM_LIMIT),
        )(gamma2, beta2, x_p, w_p, bias2)
        return out_p[:B, :F]

    # ---- two-pass streaming path (large batches) -------------------------
    nb = B_pad // tb
    # Stage-1 batch tile: as many stage-2 tiles as fit in ~2048 rows and divide nb
    # (bigger streaming tiles amortize per-step grid overhead).
    m = max(1, min(nb, 2048 // tb))
    while nb % m:
        m -= 1
    tb_stats = tb * m

    ss = pl.pallas_call(
        functools.partial(bn_stats_kernel, batch=B),
        out_shape=jax.ShapeDtypeStruct((2, H), jnp.float32),
        grid=(B_pad // tb_stats,),
        in_specs=[
            pl.BlockSpec((1, H), lambda i: (0, 0)),             # gamma (DMA'd once)
            pl.BlockSpec((1, H), lambda i: (0, 0)),             # beta  (DMA'd once)
            pl.BlockSpec((tb_stats, H), lambda i: (i, 0)),      # x streaming tile
        ],
        out_specs=pl.BlockSpec((2, H), lambda i: (0, 0)),
        scratch_shapes=[pltpu.VMEM((2, H), jnp.float32)],
        compiler_params=pltpu.CompilerParams(
            dimension_semantics=("arbitrary",),
            vmem_limit_bytes=VMEM_LIMIT),
    )(gamma2, beta2, x_p)

    # j (feature tiles) is the fast axis: x tile is re-fetched only when i changes
    # (weight is the small bf16 operand that streams nb times).
    out_p = pl.pallas_call(
        bn_linear_kernel,
        out_shape=jax.ShapeDtypeStruct((B_pad, F_pad), x.dtype),
        grid=(nb, nf),
        in_specs=[
            pl.BlockSpec((2, H), lambda i, j: (0, 0)),          # scale/shift
            pl.BlockSpec((tb, H), lambda i, j: (i, 0)),         # x tile
            pl.BlockSpec((tf, H), lambda i, j: (j, 0)),         # bf16 weight tile
            pl.BlockSpec((1, tf), lambda i, j: (0, j)),         # bias tile
        ],
        out_specs=pl.BlockSpec((tb, tf), lambda i, j: (i, j)),
        scratch_shapes=[pltpu.VMEM((tb, H), jnp.bfloat16)],
        compiler_params=pltpu.CompilerParams(
            dimension_semantics=("parallel", "arbitrary"),
            vmem_limit_bytes=VMEM_LIMIT),
    )(ss, x_p, w_p, bias2)

    return out_p[:B, :F]


# ---------------------------------------------------------------------------
# Pure-JAX reference (f32 end to end, training-mode BatchNorm forward).
# TODO(synk): running_mean/running_var buffer updates are not tracked (forward-only).
# ---------------------------------------------------------------------------
def bertfc_reference(x, gamma, beta, w, b):
    xf = x.astype(jnp.float32)
    mean = jnp.mean(xf, axis=0, keepdims=True)
    var = jnp.mean((xf - mean) ** 2, axis=0, keepdims=True)
    y = (xf - mean) * jax.lax.rsqrt(var + EPS) * gamma[None, :] + beta[None, :]
    return (y @ w.T + b[None, :]).astype(x.dtype)


if __name__ == "__main__":
    key = jax.random.PRNGKey(0)
    B = 20             # deliberately not a multiple of 8: exercises batch padding
    feature_size = 64  # < 128: exercises lane-padding of the feature dim

    k_x, k_g, k_b, k_w, k_bias = jax.random.split(key, 5)
    x = jax.random.normal(k_x, (B, HIDDEN), dtype=jnp.float32)

    # BatchNorm1d defaults (weight=1, bias=0) perturbed so the affine path is exercised.
    gamma = 1.0 + 0.1 * jax.random.normal(k_g, (HIDDEN,), dtype=jnp.float32)
    beta = 0.1 * jax.random.normal(k_b, (HIDDEN,), dtype=jnp.float32)
    # Linear default init: uniform(-1/sqrt(768), 1/sqrt(768)).
    bound = 1.0 / (HIDDEN ** 0.5)
    w = jax.random.uniform(k_w, (feature_size, HIDDEN), jnp.float32, -bound, bound)
    b = jax.random.uniform(k_bias, (feature_size,), jnp.float32, -bound, bound)

    ref = bertfc_reference(x, gamma, beta, w, b)

    # Fused single-pass path (auto for this size).
    out_fused = jax.block_until_ready(bertfc_forward(x, gamma, beta, w, b, fused=True))
    assert out_fused.shape == (B, feature_size)
    # Tolerance loosened vs pure-f32 reference because the MXU operands are bf16.
    assert jnp.allclose(out_fused, ref, atol=2e-2, rtol=2e-2), "fused path mismatch"

    # Two-pass streaming path (forced, to exercise the large-batch code path).
    out_stream = jax.block_until_ready(bertfc_forward(x, gamma, beta, w, b, fused=False))
    assert out_stream.shape == (B, feature_size)
    assert jnp.allclose(out_stream, ref, atol=2e-2, rtol=2e-2), "streaming path mismatch"

    print("KERNEL_OK")
</pallas_src>

<mosaic_0001>
module attributes {stable_mosaic.version = 11 : i64} {
  func.func @bn_linear_fused_kernel(%arg0: i32, %arg1: memref<1x768xf32, #tpu.memory_space<vmem>>, %arg2: memref<1x768xf32, #tpu.memory_space<vmem>>, %arg3: memref<24x768xf32, #tpu.memory_space<vmem>>, %arg4: memref<128x768xbf16, #tpu.memory_space<vmem>>, %arg5: memref<1x128xf32, #tpu.memory_space<vmem>>, %arg6: memref<24x128xf32, #tpu.memory_space<vmem>>, %arg7: memref<24x768xbf16, #tpu.memory_space<vmem>>) attributes {dimension_semantics = [#tpu.dimension_semantics<arbitrary>], iteration_bounds = array<i64: 1>, scalar_prefetch = 0 : i64, scratch_operands = 1 : i64, tpu.core_type = #tpu.core_type<tc>, window_params = [{pipeline_mode = #tpu.pipeline_mode<synchronous>, transform_indices = @transform_0, window_bounds = array<i64: 1, 768>}, {pipeline_mode = #tpu.pipeline_mode<synchronous>, transform_indices = @transform_1, window_bounds = array<i64: 1, 768>}, {pipeline_mode = #tpu.pipeline_mode<synchronous>, transform_indices = @transform_2, window_bounds = array<i64: 24, 768>}, {transform_indices = @transform_3, window_bounds = array<i64: 128, 768>}, {transform_indices = @transform_4, window_bounds = array<i64: 1, 128>}, {transform_indices = @transform_5, window_bounds = array<i64: 24, 128>}]} {
    %c0_i32 = arith.constant 0 : i32
    %0 = arith.cmpi eq, %arg0, %c0_i32 : i32
    %1 = arith.extui %0 : i1 to i32
    %c0_i32_0 = arith.constant 0 : i32
    %2 = arith.cmpi ne, %1, %c0_i32_0 : i32
    scf.if %2 {
      %c0_8 = arith.constant 0 : index
      %c0_9 = arith.constant 0 : index
      %10 = vector.load %arg3[%c0_8, %c0_9] : memref<24x768xf32, #tpu.memory_space<vmem>>, vector<24x768xf32>
      %cst_10 = arith.constant dense<0.000000e+00> : vector<768xf32>
      %11 = vector.multi_reduction <add>, %10, %cst_10 [0] : vector<24x768xf32> to vector<768xf32>
      %12 = vector.shape_cast %11 : vector<768xf32> to vector<1x768xf32>
      %cst_11 = arith.constant 2.000000e+01 : f32
      %13 = vector.broadcast %cst_11 : f32 to vector<1x768xf32>
      %14 = arith.divf %12, %13 : vector<1x768xf32>
      %15 = arith.mulf %10, %10 : vector<24x768xf32>
      %cst_12 = arith.constant dense<0.000000e+00> : vector<768xf32>
      %16 = vector.multi_reduction <add>, %15, %cst_12 [0] : vector<24x768xf32> to vector<768xf32>
      %17 = vector.shape_cast %16 : vector<768xf32> to vector<1x768xf32>
      %cst_13 = arith.constant 2.000000e+01 : f32
      %18 = vector.broadcast %cst_13 : f32 to vector<1x768xf32>
      %19 = arith.divf %17, %18 : vector<1x768xf32>
      %20 = arith.mulf %14, %14 : vector<1x768xf32>
      %21 = arith.subf %19, %20 : vector<1x768xf32>
      %cst_14 = arith.constant 0.000000e+00 : f32
      %22 = vector.broadcast %cst_14 : f32 to vector<1x768xf32>
      %23 = arith.maximumf %21, %22 : vector<1x768xf32>
      %cst_15 = arith.constant 9.99999974E-6 : f32
      %24 = vector.broadcast %cst_15 : f32 to vector<1x768xf32>
      %25 = arith.addf %23, %24 : vector<1x768xf32>
      %26 = math.rsqrt %25 : vector<1x768xf32>
      %c0_16 = arith.constant 0 : index
      %c0_17 = arith.constant 0 : index
      %27 = vector.load %arg1[%c0_16, %c0_17] : memref<1x768xf32, #tpu.memory_space<vmem>>, vector<1x768xf32>
      %28 = arith.mulf %27, %26 : vector<1x768xf32>
      %c0_18 = arith.constant 0 : index
      %c0_19 = arith.constant 0 : index
      %29 = vector.load %arg2[%c0_18, %c0_19] : memref<1x768xf32, #tpu.memory_space<vmem>>, vector<1x768xf32>
      %30 = arith.mulf %14, %28 : vector<1x768xf32>
      %31 = arith.subf %29, %30 : vector<1x768xf32>
      %32 = vector.broadcast %28 : vector<1x768xf32> to vector<24x768xf32>
      %33 = arith.mulf %10, %32 : vector<24x768xf32>
      %34 = vector.broadcast %31 : vector<1x768xf32> to vector<24x768xf32>
      %35 = arith.addf %33, %34 : vector<24x768xf32>
      %36 = arith.truncf %35 : vector<24x768xf32> to vector<24x768xbf16>
      %c0_20 = arith.constant 0 : index
      %c0_21 = arith.constant 0 : index
      %37 = vector.load %arg7[%c0_20, %c0_21] : memref<24x768xbf16, #tpu.memory_space<vmem>>, vector<24x768xbf16>
      tpu.vector_store %arg7[%c0_20, %c0_21], %36 {strides = array<i32>} : memref<24x768xbf16, #tpu.memory_space<vmem>>, vector<24x768xbf16>,
    } else {
    }
    %c0 = arith.constant 0 : index
    %c0_1 = arith.constant 0 : index
    %3 = vector.load %arg7[%c0, %c0_1] : memref<24x768xbf16, #tpu.memory_space<vmem>>, vector<24x768xbf16>
    %c0_2 = arith.constant 0 : index
    %c0_3 = arith.constant 0 : index
    %4 = vector.load %arg4[%c0_2, %c0_3] : memref<128x768xbf16, #tpu.memory_space<vmem>>, vector<128x768xbf16>
    %cst = arith.constant dense<0.000000e+00> : vector<24x128xf32>
    %5 = tpu.matmul %3, %4, %cst {dimension_numbers = #tpu.dot_dimension_numbers<[1], [1], [0], [0], [0, 0, 1, 0], [], []>} : vector<24x768xbf16>, vector<128x768xbf16>, vector<24x128xf32> -> vector<24x128xf32>
    %c0_4 = arith.constant 0 : index
    %c0_5 = arith.constant 0 : index
    %6 = vector.load %arg5[%c0_4, %c0_5] : memref<1x128xf32, #tpu.memory_space<vmem>>, vector<1x128xf32>
    %7 = vector.broadcast %6 : vector<1x128xf32> to vector<24x128xf32>
    %8 = arith.addf %5, %7 : vector<24x128xf32>
    %c0_6 = arith.constant 0 : index
    %c0_7 = arith.constant 0 : index
    %9 = vector.load %arg6[%c0_6, %c0_7] : memref<24x128xf32, #tpu.memory_space<vmem>>, vector<24x128xf32>
    tpu.vector_store %arg6[%c0_6, %c0_7], %8 {strides = array<i32>} : memref<24x128xf32, #tpu.memory_space<vmem>>, vector<24x128xf32>,
    return
  }
  func.func @transform_0(%arg0: i32) -> (i32, i32) {
    %c0_i32 = arith.constant 0 : i32
    %c0_i32_0 = arith.constant 0 : i32
    %c0_i32_1 = arith.constant 0 : i32
    return %c0_i32, %c0_i32_0 : i32, i32
  }
  func.func @transform_1(%arg0: i32) -> (i32, i32) {
    %c0_i32 = arith.constant 0 : i32
    %c0_i32_0 = arith.constant 0 : i32
    %c0_i32_1 = arith.constant 0 : i32
    return %c0_i32, %c0_i32_0 : i32, i32
  }
  func.func @transform_2(%arg0: i32) -> (i32, i32) {
    %c0_i32 = arith.constant 0 : i32
    %c0_i32_0 = arith.constant 0 : i32
    %c0_i32_1 = arith.constant 0 : i32
    return %c0_i32, %c0_i32_0 : i32, i32
  }
  func.func @transform_3(%arg0: i32) -> (i32, i32) {
    %c0_i32 = arith.constant 0 : i32
    %c0_i32_0 = arith.constant 0 : i32
    return %arg0, %c0_i32 : i32, i32
  }
  func.func @transform_4(%arg0: i32) -> (i32, i32) {
    %c0_i32 = arith.constant 0 : i32
    %c0_i32_0 = arith.constant 0 : i32
    return %c0_i32, %arg0 : i32, i32
  }
  func.func @transform_5(%arg0: i32) -> (i32, i32) {
    %c0_i32 = arith.constant 0 : i32
    %c0_i32_0 = arith.constant 0 : i32
    return %c0_i32, %arg0 : i32, i32
  }
}

</mosaic_0001>

<bundles_post_ra>
// kernel: tpu_custom_call.1
= control target key start
LH: loop header
LB: loop body
LE: loop exit
PB: predicated region body
PF: predicated region fallthrough
CT: control target
= control target key end

     0   :  { %10 = vsyncpa [#allocation4], 0  ;;  %s1638_s0 = inlined_call_operand.hbm [shape: f32[1,768], index: 0, kind: input, shape index: {}]   ;;  %s1639_s1 = inlined_call_operand.hbm [shape: f32[1,768], index: 1, kind: input, shape index: {}]   ;;  %s1640_s2 = inlined_call_operand.hbm [shape: f32[24,768], index: 2, kind: input, shape index: {}]   ;;  %s1641_s3 = inlined_call_operand.hbm [shape: bf16[128,768], index: 3, kind: input, shape index: {}]   ;;  %s1642_s4 = inlined_call_operand.vmem [shape: f32[1,128], index: 4, kind: input, shape index: {}]   ;;  %s1643_s5 = inlined_call_operand.hbm [shape: f32[24,128], index: 5, kind: output, shape index: {}]  }
   0x1   :  { %11 = vsyncpa [#allocation7], 0 }
   0x2   :  { %12 = vsyncpa [#allocation10], 0 }
   0x3   :  { %13 = vsyncpa [#allocation5], 0  ;;  %s1376_s18 = smov [#allocation6]   ;;  %s1377_s20 = smov [#allocation3]  }
   0x4   :  { %s30_s19 = sshll.u32 %s1376_s18, 4  ;;  %s20_s21 = sshll.u32 %s1377_s20, 4  ;;  %s31_s19 = int_to_ptr.vmem [resolvable:$true] %s30_s19  ;;  %s21_s21 = int_to_ptr.vmem [resolvable:$true] %s20_s21 }
   0x5   :  { %s1258_s24 = scalar_lea.hbm %s1639_s1, 96 }
   0x6   :  { %p1259_p0 = scmp.ne.s32.totalorder %s1639_s1, %s1258_s24  ;;  %p1262_p1 = scmp.lt.u32.totalorder %s1258_s24, %s1639_s1 }
   0x8   :  { %p1264_p2 = pnand %p1262_p1, %p1259_p0 }
   0xa   :  { %1267 = shalt.err (!%p1264_p2)
}
   0xb   :  { %s1268_s29 = scalar_lea.vmem %s31_s19, 96  ;;  %p1273_p4 = scmp.lt.s32.totalorder %s31_s19, %s31_s19 }
   0xc   :  { %p1269_p3 = scmp.ne.s32.totalorder %s31_s19, %s1268_s29  ;;  %p1274_p5 = scmp.lt.s32.totalorder %s1268_s29, %s1268_s29 }
   0xe   :  { %p1275_p6 = por %p1274_p5, %p1273_p4 }
  0x10   :  { %p1276_p7 = pnand %p1275_p6, %p1269_p3 }
  0x12   :  { %1279 = shalt.err (!%p1276_p7)
}
  0x13   :  { %33 = dma.hbm_to_vmem [thread:$0]  %s1639_s1, 96, %s31_s19, [#allocation7]  }
  0x14   :  { %s1280_s9 = scalar_lea.hbm %s1638_s0, 96 }
  0x15   :  { %p1281_p8 = scmp.ne.s32.totalorder %s1638_s0, %s1280_s9  ;;  %p1284_p9 = scmp.lt.u32.totalorder %s1280_s9, %s1638_s0 }
  0x17   :  { %p1286_p10 = pnand %p1284_p9, %p1281_p8 }
  0x19   :  { %1289 = shalt.err (!%p1286_p10)
}
  0x1a   :  { %s1290_s14 = scalar_lea.vmem %s21_s21, 96  ;;  %p1295_p12 = scmp.lt.s32.totalorder %s21_s21, %s21_s21 }
  0x1b   :  { %p1291_p11 = scmp.ne.s32.totalorder %s21_s21, %s1290_s14  ;;  %p1296_p13 = scmp.lt.s32.totalorder %s1290_s14, %s1290_s14 }
  0x1d   :  { %p1297_p0 = por %p1296_p13, %p1295_p12 }
  0x1f   :  { %p1298_p1 = pnand %p1297_p0, %p1291_p11 }
  0x21   :  { %1301 = shalt.err (!%p1298_p1)
}
  0x22   :  { %23 = dma.hbm_to_vmem [thread:$0]  %s1638_s0, 96, %s21_s21, [#allocation4]  }
  0x23   :  { %s1378_s16 = smov [#allocation8]   ;;  %s1302_s20 = scalar_lea.hbm %s1640_s2, 2304 }
  0x24   :  { %s39_s17 = sshll.u32 %s1378_s16, 4  ;;  %p1303_p2 = scmp.ne.s32.totalorder %s1640_s2, %s1302_s20  ;;  %s40_s17 = int_to_ptr.vmem [resolvable:$true] %s39_s17 }
  0x25   :  { %p1306_p3 = scmp.lt.u32.totalorder %s1302_s20, %s1640_s2 }
  0x27   :  { %p1308_p4 = pnand %p1306_p3, %p1303_p2 }
  0x29   :  { %1311 = shalt.err (!%p1308_p4)
}
  0x2a   :  { %s1312_s26 = scalar_lea.vmem %s40_s17, 2304  ;;  %p1317_p6 = scmp.lt.s32.totalorder %s40_s17, %s40_s17 }
  0x2b   :  { %p1313_p5 = scmp.ne.s32.totalorder %s40_s17, %s1312_s26  ;;  %p1318_p7 = scmp.lt.s32.totalorder %s1312_s26, %s1312_s26 }
  0x2d   :  { %p1319_p8 = por %p1318_p7, %p1317_p6 }
  0x2f   :  { %p1320_p9 = pnand %p1319_p8, %p1313_p5 }
  0x31   :  { %1323 = shalt.err (!%p1320_p9)
}
  0x32   :  { %s1379_s0 = smov 768   ;;  %s1380_s21 = smov 48  }
  0x33   :  { %45 = dma.hbm_to_vmem [thread:$0]  %s1640_s2, 2304, %s40_s17, [#allocation7], %s1379_s0, %s1379_s0, %s1380_s21  }
  0x34   :  { %s1381_s29 = smov [#allocation9]   ;;  %s1324_s8 = scalar_lea.hbm %s1641_s3, 6144 }
  0x35   :  { %s51_s30 = sshll.u32 %s1381_s29, 4  ;;  %p1325_p10 = scmp.ne.s32.totalorder %s1641_s3, %s1324_s8  ;;  %s52_s30 = int_to_ptr.vmem [resolvable:$true] %s51_s30 }
  0x36   :  { %p1328_p11 = scmp.lt.u32.totalorder %s1324_s8, %s1641_s3 }
  0x38   :  { %p1330_p12 = pnand %p1328_p11, %p1325_p10 }
  0x3a   :  { %1333 = shalt.err (!%p1330_p12)
}
  0x3b   :  { %s1334_s13 = scalar_lea.vmem %s52_s30, 6144  ;;  %p1339_p0 = scmp.lt.s32.totalorder %s52_s30, %s52_s30 }
  0x3c   :  { %p1335_p13 = scmp.ne.s32.totalorder %s52_s30, %s1334_s13  ;;  %p1340_p1 = scmp.lt.s32.totalorder %s1334_s13, %s1334_s13 }
  0x3e   :  { %p1341_p2 = por %p1340_p1, %p1339_p0 }
  0x40   :  { %p1342_p3 = pnand %p1341_p2, %p1335_p13 }
  0x42   :  { %1345 = shalt.err (!%p1342_p3)
}
  0x43   :  { %s1382_s2 = smov 384   ;;  %s1383_s14 = smov 24  }
  0x44   :  { %57 = dma.hbm_to_vmem [thread:$0]  %s1641_s3, 6144, %s52_s30, [#allocation10], %s1382_s2, %s1382_s2, %s1383_s14  }
  0x45   :  { %1368 = dma.done.wait [#allocation4], 96  }
  0x46   :  { %1369 = vsyncadd [#allocation4], 4294967200 }
  0x47   :  { %1370 = dma.done.wait [#allocation7], 2400  }
  0x48   :  { %1371 = vsyncadd [#allocation7], 4294964896 }
  0x49   :  { %1372 = dma.done.wait [#allocation10], 6144  }
  0x4a   :  { %1373 = vsyncadd [#allocation10], 4294961152  ;;  %v1174_v0 = vld [vmem:[#allocation9 + $0x4] ss:$24 sps:$4 sm:$0xff]   ;;  %v1178_v2 = vld [vmem:[#allocation9] ss:$24 sps:$4 sm:$0xff]  }
  0x4b   :  { %v1176_v1 = vld [vmem:[#allocation9 + $0xc] ss:$24 sps:$4 sm:$0xff]   ;;  %878 = vmatprep.subr.bf16.mxu1 %v1174_v0  ;;  %v1179_v3 = vld [vmem:[#allocation9 + $0x8] ss:$24 sps:$4 sm:$0xff]   ;;  %v1182_v5 = vld [vmem:[#allocation9 + $0x3c] ss:$24 sps:$4 sm:$0xff]  }
  0x4c   :  { %926 = vmatprep.subr.bf16.mxu0 %v1176_v1  ;;  %v1180_v4 = vld [vmem:[#allocation9 + $0x34] ss:$24 sps:$4 sm:$0xff]   ;;  %879 = vmatpush1.bf16.xpose.msra.mxu1 %v1178_v2  ;;  %v1184_v6 = vld [vmem:[#allocation9 + $0x30] ss:$24 sps:$4 sm:$0xff]   ;;  %v1186_v8 = vld [vmem:[#allocation9 + $0x64] ss:$24 sps:$4 sm:$0xff]  }
  0x4d   :  { %927 = vmatpush1.bf16.xpose.msra.mxu0 %v1179_v3  ;;  %880 = vmatprep.subr.bf16.mxu1 %v1180_v4  ;;  %v1185_v7 = vld [vmem:[#allocation9 + $0x38] ss:$24 sps:$4 sm:$0xff]   ;;  %v1188_v9 = vld [vmem:[#allocation9 + $0x6c] ss:$24 sps:$4 sm:$0xff]   ;;  %v1191_v11 = vld [vmem:[#allocation9 + $0x68] ss:$24 sps:$4 sm:$0xff]  }
  0x4e   :  { %928 = vmatprep.subr.bf16.mxu0 %v1182_v5  ;;  %v1190_v10 = vld [vmem:[#allocation9 + $0x60] ss:$24 sps:$4 sm:$0xff]   ;;  %v1192_v12 = vld [vmem:[#allocation9 + $0x94] ss:$24 sps:$4 sm:$0xff]   ;;  %v1196_v16 = vld [vmem:[#allocation9 + $0x90] ss:$24 sps:$4 sm:$0xff]  }
  0x4f   :  { %v1194_v13 = vld [vmem:[#allocation9 + $0x9c] ss:$24 sps:$4 sm:$0xff]   ;;  %v1197_v17 = vld [vmem:[#allocation9 + $0x98] ss:$24 sps:$4 sm:$0xff]   ;;  %v1470_v18 = vld [vmem:[#allocation8 + $0x10] sm:$0xff]  ;;  %s1385_s17 = smov [#allocation11]  }
  0x50   :  { %v1466_v14 = vld [vmem:[#allocation8] sm:$0xff]  ;;  %v1468_v15 = vld [vmem:[#allocation8 + $0x8] sm:$0xff]  ;;  %v1472_v19 = vld [vmem:[#allocation8 + $0x18] sm:$0xff]  ;;  %v1526_v52 = vmul.f32 %v1470_v18, %v1470_v18  ;;  %s1030_s18 = sshll.u32 %s1385_s17, 4  ;;  %s1031_s18 = int_to_ptr.vmem [resolvable:$true] %s1030_s18 }
  0x51   :  { %v1474_v20 = vld [vmem:[#allocation8 + $0x20] sm:$0xff]  ;;  %v1198_v21 = vld [vmem:[#allocation9 + $0xc4] ss:$24 sps:$4 sm:$0xff]   ;;  %v1480_v25 = vld [vmem:[#allocation8 + $0x38] sm:$0xff]  ;;  %v150_v43 = vmul.f32 %v1466_v14, %v1466_v14  ;;  %v151_v48 = vmul.f32 %v1468_v15, %v1468_v15  ;;  %v1530_v56 = vmul.f32 %v1472_v19, %v1472_v19  ;;  %p1351_p5 = scmp.lt.s32.totalorder %s1031_s18, %s1031_s18 }
  0x52   :  { %v1200_v22 = vld [vmem:[#allocation9 + $0xcc] ss:$24 sps:$4 sm:$0xff]   ;;  %v1476_v23 = vld [vmem:[#allocation8 + $0x28] sm:$0xff]  ;;  %v1482_v26 = vld [vmem:[#allocation8 + $0x40] sm:$0xff]  ;;  %v103_v30 = vadd.f32 %v1480_v25, %v1468_v15  ;;  %v154_v61 = vmul.f32 %v1474_v20, %v1474_v20 }
  0x53   :  { %v1478_v24 = vld [vmem:[#allocation8 + $0x30] sm:$0xff]  ;;  %v1484_v27 = vld [vmem:[#allocation8 + $0x48] sm:$0xff]  ;;  %v1492_v31 = vld [vmem:[#allocation8 + $0x58] sm:$0xff]  ;;  %v111_v34 = vadd.f32 %v1482_v26, %v1470_v18  ;;  %v155_v2 = vmul.f32 %v1476_v23, %v1476_v23 }
  0x54   :  { %881 = vmatpush1.bf16.xpose.msra.mxu1 %v1184_v6  ;;  %v1486_v28 = vld [vmem:[#allocation8 + $0x50] sm:$0xff]  ;;  %v95_v29 = vadd.f32 %v1478_v24, %v1466_v14  ;;  %v1494_v32 = vld [vmem:[#allocation8 + $0x60] sm:$0xff]  ;;  %v1496_v33 = vld [vmem:[#allocation8 + $0x68] sm:$0xff]  ;;  %v119_v35 = vadd.f32 %v1484_v27, %v1472_v19  ;;  %v135_v42 = vadd.f32 %v1492_v31, %v1476_v23 }
  0x55   :  { %929 = vmatpush1.bf16.xpose.msra.mxu0 %v1185_v7  ;;  %882 = vmatprep.subr.bf16.mxu1 %v1186_v8  ;;  %v127_v36 = vadd.f32 %v1486_v28, %v1474_v20  ;;  %v1504_v37 = vld [vmem:[#allocation8 + $0x70] sm:$0xff]  ;;  %v1506_v38 = vld [vmem:[#allocation8 + $0x78] sm:$0xff]  ;;  %v1508_v39 = vld [vmem:[#allocation8 + $0x80] sm:$0xff]  ;;  %v104_v41 = vadd.f32 %v103_v30, %v1496_v33  ;;  %v156_v7 = vmul.f32 %v1478_v24, %v1478_v24 }
  0x56   :  { %930 = vmatprep.subr.bf16.mxu0 %v1188_v9  ;;  %v96_v40 = vadd.f32 %v95_v29, %v1494_v32  ;;  %v1516_v44 = vld [vmem:[#allocation8 + $0x88] sm:$0xff]  ;;  %v112_v45 = vadd.f32 %v111_v34, %v1504_v37  ;;  %v120_v46 = vadd.f32 %v119_v35, %v1506_v38  ;;  %v1203_v62 = vld [vmem:[#allocation9 + $0xc8] ss:$24 sps:$4 sm:$0xff]   ;;  %v1204_v3 = vld [vmem:[#allocation9 + $0xf4] ss:$24 sps:$4 sm:$0xff]   ;;  %v158_v30 = vmul.f32 %v1482_v26, %v1482_v26 }
  0x57   :  { %v128_v47 = vadd.f32 %v127_v36, %v1508_v39  ;;  %v105_v50 = vrot.slane %v104_v41, 4  ;;  %v136_v51 = vadd.f32 %v135_v42, %v1516_v44  ;;  %v1202_v57 = vld [vmem:[#allocation9 + $0xc0] ss:$24 sps:$4 sm:$0xff]   ;;  %v1206_v8 = vld [vmem:[#allocation9 + $0xfc] ss:$24 sps:$4 sm:$0xff]   ;;  %v163_v34 = vmul.f32 %v1496_v33, %v1496_v33 }
  0x58   :  { %v97_v49 = vrot.slane %v96_v40, 4  ;;  %v113_v53 = vrot.slane %v112_v45, 4  ;;  %v121_v54 = vrot.slane %v120_v46, 4  ;;  %v159_v36 = vmul.f32 %v1484_v27, %v1484_v27 }
  0x59   :  { %v129_v55 = vrot.slane %v128_v47, 4  ;;  %v106_v59 = vadd.f32 %v105_v50, %v104_v41  ;;  %v137_v60 = vrot.slane %v136_v51, 4  ;;  %v161_v50 = vmul.f32 %v1492_v31, %v1492_v31 }
  0x5a   :  { %v98_v58 = vadd.f32 %v97_v49, %v96_v40  ;;  %v114_v63 = vadd.f32 %v113_v53, %v112_v45  ;;  %v122_v0 = vadd.f32 %v121_v54, %v120_v46  ;;  %v168_v40 = vadd.f32 %v156_v7, %v150_v43 }
  0x5b   :  { %v130_v1 = vadd.f32 %v129_v55, %v128_v47  ;;  %v107_v5 = vrot.slane %v106_v59, 2  ;;  %v138_v6 = vadd.f32 %v137_v60, %v136_v51  ;;  %v160_v49 = vmul.f32 %v1486_v28, %v1486_v28 }
  0x5c   :  { %883 = vmatpush1.bf16.xpose.msra.mxu1 %v1190_v10  ;;  %v99_v4 = vrot.slane %v98_v58, 2  ;;  %v115_v9 = vrot.slane %v114_v63, 2  ;;  %v123_v10 = vrot.slane %v122_v0, 2  ;;  %v164_v54 = vmul.f32 %v1504_v37, %v1504_v37 }
  0x5d   :  { %931 = vmatpush1.bf16.xpose.msra.mxu0 %v1191_v11  ;;  %884 = vmatprep.subr.bf16.mxu1 %v1192_v12  ;;  %v131_v11 = vrot.slane %v130_v1, 2  ;;  %v157_v12 = vmul.f32 %v1480_v25, %v1480_v25  ;;  %v165_v43 = vmul.f32 %v1506_v38, %v1506_v38  ;;  %v167_v60 = vmul.f32 %v1516_v44, %v1516_v44 }
  0x5e   :  { %932 = vmatprep.subr.bf16.mxu0 %v1194_v13  ;;  %v100_v13 = vadd.f32 %v99_v4, %v98_v58  ;;  %v124_v29 = vadd.f32 %v123_v10, %v122_v0  ;;  %v1209_v58 = vld [vmem:[#allocation9 + $0xf8] ss:$24 sps:$4 sm:$0xff]   ;;  %v1212_v0 = vld [vmem:[#allocation9 + $0x12c] ss:$24 sps:$4 sm:$0xff]  }
  0x5f   :  { %v132_v35 = vadd.f32 %v131_v11, %v130_v1  ;;  %v176_v46 = vadd.f32 %v157_v12, %v151_v48  ;;  %v166_v48 = vmul.f32 %v1508_v39, %v1508_v39  ;;  %v200_v12 = vadd.f32 %v160_v49, %v154_v61  ;;  %v1215_v61 = vld [vmem:[#allocation9 + $0x128] ss:$24 sps:$4 sm:$0xff]   ;;  %v1216_v49 = vld [vmem:[#allocation9 + $0x154] ss:$24 sps:$4 sm:$0xff]  }
  0x60   :  { %v101_v41 = vrot.slane %v100_v13, 1  ;;  %v125_v53 = vrot.slane %v124_v29, 1 }
  0x61   :  { %v177_v55 = vadd.f32 %v176_v46, %v163_v34 }
  0x62   :  { %v102_v1 = vadd.f32 %v101_v41, %v100_v13  ;;  %v126_v10 = vadd.f32 %v125_v53, %v124_v29 }
  0x64   :  { %885 = vmatpush1.bf16.xpose.msra.mxu1 %v1196_v16  ;;  %v108_v16 = vadd.f32 %v107_v5, %v106_v59  ;;  %v133_v59 = vrot.slane %v132_v35, 1  ;;  %v184_v5 = vadd.f32 %v158_v30, %v1526_v52  ;;  %v201_v52 = vadd.f32 %v200_v12, %v166_v48  ;;  %v1214_v30 = vld [vmem:[#allocation9 + $0x120] ss:$24 sps:$4 sm:$0xff]  }
  0x65   :  { %933 = vmatpush1.bf16.xpose.msra.mxu0 %v1197_v17  ;;  %886 = vmatprep.subr.bf16.mxu1 %v1198_v21  ;;  %v139_v17 = vrot.slane %v138_v6, 2  ;;  %v162_v21 = vmul.f32 %v1494_v32, %v1494_v32  ;;  %v1562_v41 = vmul.f32 0.05, %v102_v1 }
  0x66   :  { %934 = vmatprep.subr.bf16.mxu0 %v1200_v22  ;;  %v116_v22 = vadd.f32 %v115_v9, %v114_v63  ;;  %v109_v42 = vrot.slane %v108_v16, 1  ;;  %v1210_v63 = vld [vmem:[#allocation9 + $0x124] ss:$24 sps:$4 sm:$0xff]   ;;  %v192_v9 = vadd.f32 %v159_v36, %v1530_v56  ;;  %v185_v11 = vadd.f32 %v184_v5, %v164_v54 }
  0x67   :  { %v140_v45 = vadd.f32 %v139_v17, %v138_v6  ;;  %v169_v51 = vadd.f32 %v168_v40, %v162_v21  ;;  %v208_v17 = vadd.f32 %v161_v50, %v155_v2  ;;  %v134_v21 = vadd.f32 %v133_v59, %v132_v35  ;;  %v1218_v54 = vld [vmem:[#allocation9 + $0x15c] ss:$24 sps:$4 sm:$0xff]  }
  0x68   :  { %v117_v47 = vrot.slane %v116_v22, 1  ;;  %v193_v46 = vadd.f32 %v192_v9, %v165_v43  ;;  %v202_v35 = vrot.slane %v201_v52, 4  ;;  %v1568_v43 = vmul.f32 0.05, %v126_v10 }
  0x69   :  { %v141_v4 = vrot.slane %v140_v45, 1 }
  0x6a   :  { %v118_v6 = vadd.f32 %v117_v47, %v116_v22  ;;  %v209_v22 = vadd.f32 %v208_v17, %v167_v60  ;;  %v194_v36 = vrot.slane %v193_v46, 4 }
  0x6b   :  { %v142_v13 = vadd.f32 %v141_v4, %v140_v45 }
  0x6c   :  { %887 = vmatpush1.bf16.xpose.msra.mxu1 %v1202_v57  ;;  %v1208_v57 = vld [vmem:[#allocation9 + $0xf0] ss:$24 sps:$4 sm:$0xff]   ;;  %v210_v47 = vrot.slane %v209_v22, 4  ;;  %v1566_v50 = vmul.f32 0.05, %v118_v6  ;;  %v195_v53 = vadd.f32 %v194_v36, %v193_v46 }
  0x6d   :  { %935 = vmatpush1.bf16.xpose.msra.mxu0 %v1203_v62  ;;  %888 = vmatprep.subr.bf16.mxu1 %v1204_v3  ;;  %v170_v62 = vrot.slane %v169_v51, 4  ;;  %v110_v3 = vadd.f32 %v109_v42, %v108_v16  ;;  %v186_v16 = vrot.slane %v185_v11, 4 }
  0x6e   :  { %936 = vmatprep.subr.bf16.mxu0 %v1206_v8  ;;  %v178_v8 = vrot.slane %v177_v55, 4  ;;  %v196_v60 = vrot.slane %v195_v53, 2 }
  0x6f   :  { %v171_v7 = vadd.f32 %v170_v62, %v169_v51  ;;  %v1564_v2 = vmul.f32 0.05, %v110_v3  ;;  %v187_v42 = vadd.f32 %v186_v16, %v185_v11  ;;  %v222_v62 = vmul.f32 %v1562_v41, %v1562_v41 }
  0x70   :  { %v179_v40 = vadd.f32 %v178_v8, %v177_v55  ;;  %v197_v5 = vadd.f32 %v196_v60, %v195_v53  ;;  %v1576_v8 = vmul.f32 0.05, %v142_v13 }
  0x71   :  { %v172_v34 = vrot.slane %v171_v7, 2  ;;  %v188_v55 = vrot.slane %v187_v42, 2 }
  0x72   :  { %v180_v29 = vrot.slane %v179_v40, 2  ;;  %v198_v12 = vrot.slane %v197_v5, 1 }
  0x73   :  { %v173_v56 = vadd.f32 %v172_v34, %v171_v7  ;;  %v223_v7 = vmul.f32 %v1564_v2, %v1564_v2 }
  0x74   :  { %889 = vmatpush1.bf16.xpose.msra.mxu1 %v1208_v57  ;;  %v181_v45 = vadd.f32 %v180_v29, %v179_v40  ;;  %v203_v57 = vadd.f32 %v202_v35, %v201_v52  ;;  %v225_v52 = vmul.f32 %v1568_v43, %v1568_v43 }
  0x75   :  { %937 = vmatpush1.bf16.xpose.msra.mxu0 %v1209_v58  ;;  %890 = vmatprep.subr.bf16.mxu1 %v1210_v63  ;;  %v174_v51 = vrot.slane %v173_v56, 1  ;;  %v211_v58 = vadd.f32 %v210_v47, %v209_v22  ;;  %v1572_v63 = vmul.f32 0.05, %v134_v21  ;;  %v224_v21 = vmul.f32 %v1566_v50, %v1566_v50  ;;  %v1220_v22 = vld [vmem:[#allocation9 + $0x150] ss:$24 sps:$4 sm:$0xff]  }
  0x76   :  { %938 = vmatprep.subr.bf16.mxu0 %v1212_v0  ;;  %v182_v48 = vrot.slane %v181_v45, 1  ;;  %v189_v0 = vadd.f32 %v188_v55, %v187_v42  ;;  %v204_v1 = vrot.slane %v203_v57, 2  ;;  %v227_v47 = vmul.f32 %v1576_v8, %v1576_v8 }
  0x77   :  { %v175_v59 = vadd.f32 %v174_v51, %v173_v56  ;;  %v212_v3 = vrot.slane %v211_v58, 2  ;;  %v199_v56 = vadd.f32 %v198_v12, %v197_v5  ;;  %v226_v13 = vmul.f32 %v1572_v63, %v1572_v63 }
  0x78   :  { %v183_v4 = vadd.f32 %v182_v48, %v181_v45  ;;  %v190_v9 = vrot.slane %v189_v0, 1  ;;  %v205_v10 = vadd.f32 %v204_v1, %v203_v57 }
  0x79   :  { %v216_v6 = vmul.f32 0.05, %v175_v59  ;;  %v213_v11 = vadd.f32 %v212_v3, %v211_v58  ;;  %v219_v51 = vmul.f32 0.05, %v199_v56 }
  0x7a   :  { %v217_v17 = vmul.f32 0.05, %v183_v4  ;;  %v191_v40 = vadd.f32 %v190_v9, %v189_v0  ;;  %v206_v46 = vrot.slane %v205_v10, 1 }
  0x7b   :  { %v228_v34 = vsub.f32 %v216_v6, %v222_v62  ;;  %v214_v16 = vrot.slane %v213_v11, 1  ;;  %v231_v58 = vsub.f32 %v219_v51, %v225_v52  ;;  %v265_v6 = vlaneseq }
  0x7c   :  { %891 = vmatpush1.bf16.xpose.msra.mxu1 %v1214_v30  ;;  %v1221_v30 = vld [vmem:[#allocation9 + $0x158] ss:$24 sps:$4 sm:$0xff]   ;;  %v229_v29 = vsub.f32 %v217_v17, %v223_v7  ;;  %v218_v35 = vmul.f32 0.05, %v191_v40 }
  0x7d   :  { %939 = vmatpush1.bf16.xpose.msra.mxu0 %v1215_v61  ;;  %892 = vmatprep.subr.bf16.mxu1 %v1216_v49  ;;  %v234_v36 = vmax.f32 %v228_v34, 0.0  ;;  %v207_v61 = vadd.f32 %v206_v46, %v205_v10  ;;  %v215_v42 = vadd.f32 %v214_v16, %v213_v11  ;;  %v1224_v49 = vld [vmem:[#allocation9 + $0x14] ss:$24 sps:$4 sm:$0xff]   ;;  %v237_v0 = vmax.f32 %v231_v58, 0.0 }
  0x7e   :  { %940 = vmatprep.subr.bf16.mxu0 %v1218_v54  ;;  %v235_v45 = vmax.f32 %v229_v29, 0.0  ;;  %v230_v57 = vsub.f32 %v218_v35, %v224_v21  ;;  %v1384_v10 = vmov 1966171168   ;;  %v1586_v17 = vshrl.u32 %v265_v6, 7 }
  0x7f   :  { %v240_v53 = vadd.f32 1e-05, %v234_v36  ;;  %v220_v54 = vmul.f32 0.05, %v207_v61  ;;  %v221_v55 = vmul.f32 0.05, %v215_v42  ;;  %v263_v11 = vunpack.c.l.s4 %v1384_v10 }
  0x80   :  { %v241_v59 = vadd.f32 1e-05, %v235_v45  ;;  %v236_v62 = vmax.f32 %v230_v57, 0.0  ;;  %v243_v5 = vadd.f32 1e-05, %v237_v0  ;;  %v305_v51 = vsub.s32 0, %v1586_v17 }
  0x81   :  { %1246 = vrsqrt.f32 %v240_v53  ;;  %v232_v48 = vsub.f32 %v220_v54, %v226_v13  ;;  %v233_v60 = vsub.f32 %v221_v55, %v227_v47  ;;  %v264_v12 = vunpack.c.0.s8 %v263_v11 }
  0x82   :  { %1248 = vrsqrt.f32 %v241_v59  ;;  %v242_v4 = vadd.f32 1e-05, %v236_v62  ;;  %v309_v53 = vsub.s32 1, %v1586_v17  ;;  %v313_v54 = vsub.s32 2, %v1586_v17 }
  0x83   :  { %v238_v1 = vmax.f32 %v232_v48, 0.0  ;;  %v239_v3 = vmax.f32 %v233_v60, 0.0  ;;  %v267_v46 = vsub.s32 %v264_v12, %v1586_v17  ;;  %v317_v55 = vsub.s32 3, %v1586_v17 }
  0x84   :  { %893 = vmatpush1.bf16.xpose.msra.mxu1 %v1220_v22  ;;  %1250 = vrsqrt.f32 %v242_v4  ;;  %v321_v57 = vsub.s32 4, %v1586_v17  ;;  %v325_v58 = vsub.s32 5, %v1586_v17 }
  0x85   :  { %941 = vmatpush1.bf16.xpose.msra.mxu0 %v1221_v30  ;;  %1135 = vmatprep.subr.bf16.mxu1 %v1224_v49  ;;  %v244_v7 = vadd.f32 1e-05, %v238_v1  ;;  %v245_v9 = vadd.f32 1e-05, %v239_v3  ;;  %1252 = vrsqrt.f32 %v243_v5 }
  0x86   :  { %974 = vmatprep.subr.bf16.mxu0 %v1224_v49  ;;  %v252_v49 = vld [vmem:[#allocation3] sm:$0x3f] }
  0x87   :  { %1254 = vrsqrt.f32 %v244_v7 }
  0x88   :  { %1256 = vrsqrt.f32 %v245_v9 }
  0x8b   :  { %v1247_v21 = vpop.eup %1246 }
  0x8c   :  { %v1249_v34 = vpop.eup %1248 }
  0x8d   :  { %v259_v40 = vcombine.low %v1247_v21, %v1249_v34 }
  0x8e   :  { %v1251_v16 = vpop.eup %1250 }
  0x8f   :  { %v1253_v52 = vpop.eup %1252  ;;  %v268_v56 = vrot.slane %v259_v40, %v267_v46 }
  0x90   :  { %v260_v30 = vcombine.low %v1251_v16, %v1253_v52 }
  0x91   :  { %v1255_v22 = vpop.eup %1254 }
  0x92   :  { %v1257_v13 = vpop.eup %1256  ;;  %v275_v36 = vrot.slane %v260_v30, %v267_v46 }
  0x93   :  { %v261_v29 = vcombine.low %v1255_v22, %v1257_v13 }
  0x94   :  { %v283_v42 = vcombine.low %v268_v56, %v275_v36 }
  0x95   :  { %v282_v61 = vrot.slane %v261_v29, %v267_v46 }
  0x96   :  { %v290_v35 = vrot.slane %v283_v42, %v267_v46 }
  0x97   :  { %v297_v47 = vrot.slane %v282_v61, %v267_v46 }
  0x99   :  { %v298_v45 = vcombine.low %v290_v35, %v297_v47 }
  0x9b   :  { %v300_v59 = vmul.f32 %v298_v45, %v252_v49 }
  0x9d   :  { %v306_v48 = vrot.slane %v300_v59, %v305_v51  ;;  %v310_v60 = vrot.slane %v300_v59, %v309_v53  ;;  %v314_v62 = vrot.slane %v300_v59, %v313_v54  ;;  %v318_v0 = vrot.slane %v300_v59, %v317_v55 }
  0x9e   :  { %v322_v1 = vrot.slane %v300_v59, %v321_v57  ;;  %v326_v3 = vrot.slane %v300_v59, %v325_v58 }
  0x9f   :  { %v333_v4 = vmul.f32 %v306_v48, %v1562_v41  ;;  %v334_v5 = vmul.f32 %v310_v60, %v1564_v2  ;;  %v335_v6 = vmul.f32 %v314_v62, %v1566_v50  ;;  %v336_v7 = vmul.f32 %v318_v0, %v1568_v43  ;;  %v301_v41 = vld [vmem:[#allocation6] sm:$0x3f] }
  0xa0   :  { %v337_v9 = vmul.f32 %v322_v1, %v1572_v63  ;;  %v338_v10 = vmul.f32 %v326_v3, %v1576_v8  ;;  %v388_v2 = vmul.f32 %v310_v60, %v1468_v15  ;;  %v394_v50 = vmul.f32 %v310_v60, %v1480_v25 }
  0xa1   :  { %v345_v11 = vcombine.low %v333_v4, %v334_v5  ;;  %v346_v12 = vcombine.low %v335_v6, %v336_v7  ;;  %v390_v43 = vmul.f32 %v318_v0, %v1472_v19  ;;  %v396_v63 = vmul.f32 %v318_v0, %v1484_v27 }
  0xa2   :  { %v347_v21 = vcombine.low %v337_v9, %v338_v10  ;;  %v387_v8 = vmul.f32 %v306_v48, %v1466_v14  ;;  %v393_v13 = vmul.f32 %v306_v48, %v1478_v24  ;;  %v389_v36 = vmul.f32 %v314_v62, %v1470_v18 }
  0xa3   :  { %v354_v34 = vrot.slane %v345_v11, %v267_v46  ;;  %v361_v40 = vrot.slane %v346_v12, %v267_v46  ;;  %v395_v61 = vmul.f32 %v314_v62, %v1482_v26  ;;  %v400_v42 = vmul.f32 %v310_v60, %v1496_v33 }
  0xa4   :  { %v368_v16 = vrot.slane %v347_v21, %v267_v46  ;;  %v401_v15 = vmul.f32 %v314_v62, %v1504_v37  ;;  %v399_v25 = vmul.f32 %v306_v48, %v1494_v32  ;;  %v392_v19 = vmul.f32 %v326_v3, %v1476_v23 }
  0xa5   :  { %v369_v52 = vcombine.low %v354_v34, %v361_v40  ;;  %v398_v24 = vmul.f32 %v326_v3, %v1492_v31  ;;  %v391_v18 = vmul.f32 %v322_v1, %v1474_v20  ;;  %v397_v26 = vmul.f32 %v322_v1, %v1486_v28 }
  0xa6   :  { %v383_v22 = vrot.slane %v368_v16, %v267_v46  ;;  %v403_v28 = vmul.f32 %v322_v1, %v1508_v39  ;;  %v404_v5 = vmul.f32 %v326_v3, %v1516_v44  ;;  %v1225_v44 = vld [vmem:[#allocation9 + $0x40] ss:$24 sps:$4 sm:$0xff]   ;;  %v1230_v3 = vld [vmem:[#allocation9 + $0x74] ss:$24 sps:$4 sm:$0xff]   ;;  %v1228_v16 = vld [vmem:[#allocation9 + $0x70] ss:$24 sps:$4 sm:$0xff]  }
  0xa7   :  { %v376_v30 = vrot.slane %v369_v52, %v267_v46  ;;  %v402_v46 = vmul.f32 %v318_v0, %v1506_v38  ;;  %v1227_v0 = vld [vmem:[#allocation9 + $0x44] ss:$24 sps:$4 sm:$0xff]  }
  0xa8   :  { %v1233_v52 = vld [vmem:[#allocation9 + $0xa4] ss:$24 sps:$4 sm:$0xff]  }
  0xa9   :  { %v384_v56 = vcombine.low %v376_v30, %v383_v22  ;;  %v1231_v22 = vld [vmem:[#allocation9 + $0xa0] ss:$24 sps:$4 sm:$0xff]   ;;  %v1236_v30 = vld [vmem:[#allocation9 + $0xd4] ss:$24 sps:$4 sm:$0xff]  }
  0xab   :  { %v386_v29 = vsub.f32 %v301_v41, %v384_v56  ;;  %v1234_v41 = vld [vmem:[#allocation9 + $0xd0] ss:$24 sps:$4 sm:$0xff]   ;;  %v1239_v56 = vld [vmem:[#allocation9 + $0x104] ss:$24 sps:$4 sm:$0xff]  }
  0xad   :  { %v413_v27 = vrot.slane %v386_v29, %v309_v53  ;;  %v421_v35 = vrot.slane %v386_v29, %v317_v55  ;;  %v409_v14 = vrot.slane %v386_v29, %v305_v51  ;;  %v417_v47 = vrot.slane %v386_v29, %v313_v54  ;;  %v1222_v55 = vld [vmem:[#allocation9 + $0x10] ss:$24 sps:$4 sm:$0xff]  }
  0xae   :  { %v425_v49 = vrot.slane %v386_v29, %v321_v57  ;;  %v429_v20 = vrot.slane %v386_v29, %v325_v58 }
  0xaf   :  { %v437_v38 = vadd.f32 %v413_v27, %v388_v2  ;;  %v443_v45 = vadd.f32 %v413_v27, %v394_v50  ;;  %v439_v33 = vadd.f32 %v421_v35, %v390_v43  ;;  %v445_v59 = vadd.f32 %v421_v35, %v396_v63  ;;  %v1237_v2 = vld [vmem:[#allocation9 + $0x100] ss:$24 sps:$4 sm:$0xff]   ;;  %v1242_v50 = vld [vmem:[#allocation9 + $0x134] ss:$24 sps:$4 sm:$0xff]   ;;  %v1240_v43 = vld [vmem:[#allocation9 + $0x130] ss:$24 sps:$4 sm:$0xff]  }
  0xb0   :  { %v436_v37 = vadd.f32 %v409_v14, %v387_v8  ;;  %v442_v60 = vadd.f32 %v409_v14, %v393_v13  ;;  %v438_v32 = vadd.f32 %v417_v47, %v389_v36  ;;  %v444_v48 = vadd.f32 %v417_v47, %v395_v61  ;;  %v1245_v63 = vld [vmem:[#allocation9 + $0x164] ss:$24 sps:$4 sm:$0xff]   ;;  %v1243_v8 = vld [vmem:[#allocation9 + $0x160] ss:$24 sps:$4 sm:$0xff]  }
  0xb1   :  { %v1124_v23 = vpack.c.bf16 %v443_v45, %v437_v38  ;;  %v1126_v53 = vpack.c.bf16 %v445_v59, %v439_v33  ;;  %v451_v51 = vadd.f32 %v421_v35, %v402_v46  ;;  %v449_v54 = vadd.f32 %v413_v27, %v400_v42  ;;  %v1053_v42 = vld [vmem:[%s1642_s4] ss:$0 sm:$0xff]  ;;  %s1346_s4 = scalar_lea.vmem %s1031_s18, 384 }
  0xb2   :  { %v1123_v62 = vpack.c.bf16 %v442_v60, %v436_v37  ;;  %v1125_v31 = vpack.c.bf16 %v444_v48, %v438_v32  ;;  %v450_v6 = vadd.f32 %v417_v47, %v401_v15  ;;  %v448_v7 = vadd.f32 %v409_v14, %v399_v25  ;;  %p1347_p4 = scmp.ne.s32.totalorder %s1031_s18, %s1346_s4  ;;  %p1352_p6 = scmp.lt.s32.totalorder %s1346_s4, %s1346_s4 }
  0xb3   :  { %910 = vmatprep.mubr.bf16.mxu1 %v1124_v23  ;;  %958 = vmatprep.mubr.bf16.mxu0 %v1126_v53  ;;  %v1132_v57 = vpack.c.bf16 %v451_v51, %v451_v51  ;;  %v1130_v4 = vpack.c.bf16 %v449_v54, %v449_v54  ;;  %v440_v9 = vadd.f32 %v425_v49, %v391_v18 }
  0xb4   :  { %911 = vmatmul.mubr.bf16.vlgmr.msra.gmra.mrb[0].mxu1 %v1123_v62  ;;  %959 = vmatmul.mubr.bf16.vlgmr.msra.gmra.mrb[0].mxu0 %v1125_v31  ;;  %v446_v10 = vadd.f32 %v425_v49, %v397_v26  ;;  %v441_v17 = vadd.f32 %v429_v20, %v392_v19  ;;  %v452_v58 = vadd.f32 %v425_v49, %v403_v28  ;;  %p1353_p7 = por %p1352_p6, %p1351_p5 }
  0xb5   :  { %975 = vmatpush1.bf16.xpose.msra.mxu0 %v1222_v55  ;;  %1143 = vmatpush1.bf16.xpose.msra.mxu1 %v1222_v55  ;;  %v447_v39 = vadd.f32 %v429_v20, %v398_v24  ;;  %v453_v1 = vadd.f32 %v429_v20, %v404_v5  ;;  %v1131_v12 = vpack.c.bf16 %v450_v6, %v450_v6 }
  0xb6   :  { %976 = vmatprep.subr.bf16.mxu0 %v1227_v0  ;;  %1136 = vmatprep.subr.bf16.mxu1 %v1227_v0  ;;  %v1127_v11 = vpack.c.bf16 %v446_v10, %v440_v9  ;;  %v1129_v21 = vpack.c.bf16 %v448_v7, %v448_v7  ;;  %v1133_v13 = vpack.c.bf16 %v452_v58, %v452_v58  ;;  %p1354_p8 = pnand %p1353_p7, %p1347_p4 }
  0xb7   :  { %966 = vmatprep.mubr.bf16.mxu0 %v1132_v57  ;;  %918 = vmatprep.mubr.bf16.mxu1 %v1130_v4  ;;  %v1128_v34 = vpack.c.bf16 %v447_v39, %v441_v17  ;;  %v1134_v40 = vpack.c.bf16 %v453_v1, %v453_v1 }
  0xbc   :  { %967 = vmatmul.mubr.bf16.gmra.mrb[4].mxu0 %v1131_v12  ;;  %919 = vmatmul.mubr.bf16.gmra.mrb[4].mxu1 %v1129_v21 }
  0xbd   :  { %977 = vmatpush1.bf16.xpose.msra.mxu0 %v1225_v44  ;;  %1144 = vmatpush1.bf16.xpose.msra.mxu1 %v1225_v44 }
  0xbe   :  { %978 = vmatprep.subr.bf16.mxu0 %v1230_v3  ;;  %1137 = vmatprep.subr.bf16.mxu1 %v1230_v3 }
  0xbf   :  { %1006 = vmatprep.mubr.bf16.mxu0 %v1128_v34  ;;  %1014 = vmatprep.mubr.bf16.mxu1 %v1134_v40 }
  0xc5   :  { %979 = vmatpush1.bf16.xpose.msra.mxu0 %v1228_v16  ;;  %1145 = vmatpush1.bf16.xpose.msra.mxu1 %v1228_v16 }
  0xc6   :  { %980 = vmatprep.subr.bf16.mxu0 %v1233_v52  ;;  %1138 = vmatprep.subr.bf16.mxu1 %v1233_v52 }
  0xcd   :  { %981 = vmatpush1.bf16.xpose.msra.mxu0 %v1231_v22  ;;  %1146 = vmatpush1.bf16.xpose.msra.mxu1 %v1231_v22 }
  0xce   :  { %982 = vmatprep.subr.bf16.mxu0 %v1236_v30  ;;  %1139 = vmatprep.subr.bf16.mxu1 %v1236_v30 }
  0xd5   :  { %983 = vmatpush1.bf16.xpose.msra.mxu0 %v1234_v41  ;;  %1147 = vmatpush1.bf16.xpose.msra.mxu1 %v1234_v41 }
  0xd6   :  { %984 = vmatprep.subr.bf16.mxu0 %v1239_v56  ;;  %1140 = vmatprep.subr.bf16.mxu1 %v1239_v56 }
  0xdd   :  { %985 = vmatpush1.bf16.xpose.msra.mxu0 %v1237_v2  ;;  %1148 = vmatpush1.bf16.xpose.msra.mxu1 %v1237_v2 }
  0xde   :  { %986 = vmatprep.subr.bf16.mxu0 %v1242_v50  ;;  %1141 = vmatprep.subr.bf16.mxu1 %v1242_v50 }
  0xe5   :  { %987 = vmatpush1.bf16.xpose.msra.mxu0 %v1240_v43  ;;  %1149 = vmatpush1.bf16.xpose.msra.mxu1 %v1240_v43 }
  0xe6   :  { %988 = vmatprep.subr.bf16.mxu0 %v1245_v63  ;;  %1142 = vmatprep.subr.bf16.mxu1 %v1245_v63 }
  0xed   :  { %989 = vmatpush1.bf16.xpose.msra.mxu0 %v1243_v8  ;;  %1150 = vmatpush1.bf16.xpose.msra.mxu1 %v1243_v8 }
  0xf4   :  { %1007 = vmatmul.mubr.bf16.vlgmr.msra.gmra.mrb[0].mxu0 %v1127_v11  ;;  %1015 = vmatmul.mubr.bf16.vlgmr.msra.gmra.mrb[8].mxu1 %v1133_v13 }
 0x187   :  { %v912_v29 = vpop.f32.mrb[0].mxu1 }
 0x188   :  { %v914_v36 = vpop.f32.mrb[1].mxu1  ;;  %v913_v49 = vadd.f32 %v1053_v42, %v912_v29 }
 0x189   :  { %v915_v61 = vpop.f32.mrb[2].mxu1 }
 0x18a   :  { %v917_v46 = vpop.f32.mrb[3].mxu1  ;;  %v916_v33 = vadd.f32 %v1053_v42, %v915_v61 }
 0x18f   :  { %v968_v15 = vpop.f32.mrb[4].mxu0  ;;  %v920_v25 = vpop.f32.mrb[4].mxu1 }
 0x190   :  { %v921_v19 = vadd.f32 %v1053_v42, %v920_v25  ;;  %v970_v27 = vpop.f32.mrb[5].mxu0  ;;  %v922_v35 = vpop.f32.mrb[5].mxu1 }
 0x191   :  { %v971_v14 = vpop.f32.mrb[6].mxu0  ;;  %v923_v47 = vpop.f32.mrb[6].mxu1 }
 0x192   :  { %v972_v24 = vpop.f32.mrb[7].mxu0  ;;  %v924_v18 = vpop.f32.mrb[7].mxu1  ;;  %v969_v26 = vadd.f32 %v968_v15, %v921_v19 }
 0x1c7   :  { %v1008_v38 = vpop.f32.mrb[0].mxu0  ;;  %v1016_v45 = vpop.f32.mrb[8].mxu1 }
 0x1c8   :  { %v1152_v59 = vadd.f32 %v1008_v38, %v913_v49  ;;  %v1017_v37 = vadd.f32 %v1016_v45, %v969_v26  ;;  %v1010_v60 = vpop.f32.mrb[1].mxu0  ;;  %v1018_v32 = vpop.f32.mrb[9].mxu1 }
 0x1c9   :  { %v1011_v48 = vpop.f32.mrb[2].mxu0  ;;  %v1019_v23 = vpop.f32.mrb[10].mxu1 }
 0x1ca   :  { %1022 = vst [vmem:[#allocation11] sm:$0xff] %v1152_v59  ;;  %1024 = vst [vmem:[#allocation11 + $0x10] sm:$0xff] %v1017_v37  ;;  %v1154_v53 = vadd.f32 %v1011_v48, %v916_v33  ;;  %v1013_v55 = vpop.f32.mrb[3].mxu0  ;;  %v1020_v51 = vpop.f32.mrb[11].mxu1 }
 0x1cc   :  { %1023 = vst [vmem:[#allocation11 + $0x8] sm:$0xff] %v1154_v53 }
 0x1cd   :  { %1357 = shalt.err (!%p1354_p8)
}
 0x1ce   :  { %s1358_s22 = scalar_lea.hbm %s1643_s5, 384 }
 0x1cf   :  { %p1359_p9 = scmp.ne.s32.totalorder %s1643_s5, %s1358_s22  ;;  %p1362_p10 = scmp.lt.u32.totalorder %s1358_s22, %s1643_s5 }
 0x1d1   :  { %p1364_p11 = pnand %p1362_p10, %p1359_p9 }
 0x1d3   :  { %1367 = shalt.err (!%p1364_p11)
}
 0x1d4   :  { %s1386_s0 = smov 128   ;;  %s1387_s21 = smov 8  }
 0x1d5   :  { %1036 = dma.vmem_to_hbm [thread:$0]  %s1031_s18, 384, %s1643_s5, [#allocation5], %s1386_s0, %s1386_s0, %s1387_s21  }
 0x1d6   :  { %1374 = dma.done.wait [#allocation5], 384  }
 0x1d7   :  { %1375 = vsyncadd [#allocation5], 4294966912 }
 0x1d8   :  { %1040 = vsyncpa [#allocation4], 1 }
 0x1d9   :  { %1041 = vsyncpa [#allocation7], 1 }
 0x1da   :  { %1042 = vsyncpa [#allocation10], 1 }
 0x1db   :  { %1043 = vsyncpa [#allocation5], 1 }

</bundles_post_ra>
